<compile_context>
chip_gen: v7x
topology: tpu7x:2x2x1
jax: 0.10.0
libtpu: 0.0.40
codegen_flags: <defaults>
</compile_context>

<pallas_src>
import functools
import math

import jax
import jax.numpy as jnp
from jax.experimental import pallas as pl
from jax.experimental.pallas import tpu as pltpu


def _round_up(x, m):
    return (x + m - 1) // m * m


# -----------------------------------------------------------------------------
# Stage 1 kernel: XA = scaling * (x @ A)
#   grid = (M tiles, K tiles), K innermost (reduction).
#   A is a single VMEM-resident block (constant index_map); the f32 output
#   block itself is the accumulator (same output block index across k).
# -----------------------------------------------------------------------------
def _xa_kernel(x_ref, a_ref, xa_ref, *, scaling, tk, single_k):
    k = pl.program_id(1)

    @pl.when(k == 0)
    def _init():
        xa_ref[...] = jnp.zeros_like(xa_ref)

    if single_k:
        a_blk = a_ref[...]
    else:
        start = pl.multiple_of(k * tk, 128)          # sublane-aligned slab
        a_blk = a_ref[pl.ds(start, tk), :]

    # Native-dtype MXU feed, f32 accumulation into the resident output block.
    xa_ref[...] += jnp.dot(x_ref[...], a_blk, preferred_element_type=jnp.float32)

    @pl.when(k == pl.num_programs(1) - 1)
    def _finalize():
        # Apply scaling once, on the tiny (tm, r_pad) intermediate.
        xa_ref[...] = xa_ref[...] * scaling


# -----------------------------------------------------------------------------
# Stage 2 kernel: Y = XA @ B
#   grid = (N tiles, M tiles) with N OUTERMOST, so each B slab is DMA'd exactly
#   once for the whole kernel; only the tiny XA tile is re-read per N tile.
# -----------------------------------------------------------------------------
def _xab_kernel(xa_ref, b_ref, o_ref):
    xa = xa_ref[...]                                  # f32 intermediate
    if b_ref.dtype != xa.dtype:
        # bf16 (or other low-precision) B: feed the MXU natively.
        xa = xa.astype(b_ref.dtype)
    o_ref[...] = jnp.dot(xa, b_ref[...],
                         preferred_element_type=jnp.float32).astype(o_ref.dtype)


def lora_forward(x, lora_a, lora_b, scaling, *, tm=256, tk=2048, tn=512,
                 compute_dtype=None):
    """scaling * x.reshape(-1, in_features) @ lora_a @ lora_b.

    compute_dtype: optionally cast x / A / B (and the output) to e.g.
    jnp.bfloat16 to halve the HBM-bound x stream. None keeps the input dtype.
    """
    in_features, r = lora_a.shape
    r2, out_features = lora_b.shape
    assert r == r2, "lora_a / lora_b rank mismatch"

    x2d = x.reshape(-1, in_features)
    M = x2d.shape[0]

    if compute_dtype is not None:
        x2d = x2d.astype(compute_dtype)
        lora_a = lora_a.astype(compute_dtype)
        lora_b = lora_b.astype(compute_dtype)
    out_dtype = x2d.dtype

    # Rank padded to one full lane group -> lane-dense A / B / XA.  (Do NOT pad
    # further: pure wasted FLOPs on every generation.)
    r_pad = _round_up(r, 128)

    # --- M tile: multiple of 16 (covers the bf16 packed-sublane minimum), or
    # the full M as one block when M is small.  Ragged M is handled by the
    # partial last block (OOB rows never contaminate valid rows; OOB writes are
    # dropped) -> no jnp.pad of x and no output slice.
    if M <= tm:
        tm_eff = M
    else:
        tm_eff = _round_up(min(tm, M), 16)
    n_i = pl.cdiv(M, tm_eff)

    # --- K tile: the whole K as one block when it fits, else a 128-multiple.
    if in_features <= tk:
        tk_eff = in_features
    else:
        tk_eff = _round_up(min(tk, in_features), 128)
    Kp = _round_up(in_features, tk_eff)
    if Kp != in_features:
        # Rare ragged-K case: garbage K columns would be summed into valid
        # rows, so pad x here (aligned in_features skips this entirely).
        x2d = jnp.pad(x2d, ((0, 0), (0, Kp - in_features)))
    n_k = Kp // tk_eff

    # --- N tile.
    if out_features <= tn:
        tn_eff = out_features
    else:
        tn_eff = _round_up(min(tn, out_features), 128)
    n_j = pl.cdiv(out_features, tn_eff)

    # Tiny operands: zero-pad only A (K rows + rank cols) and B (rank rows).
    # Zero padding is mathematically inert.
    ap = jnp.pad(lora_a, ((0, Kp - in_features), (0, r_pad - r)))
    bp = jnp.pad(lora_b, ((0, r_pad - r), (0, 0)))

    cparams1 = pltpu.CompilerParams(
        dimension_semantics=("parallel", "arbitrary"),
        vmem_limit_bytes=64 * 1024 * 1024)
    cparams2 = pltpu.CompilerParams(
        dimension_semantics=("parallel", "parallel"),
        vmem_limit_bytes=64 * 1024 * 1024)

    # --- Stage 1: XA = scaling * x @ A  (x streamed from HBM exactly once).
    # If profiling ever shows exposed x DMA, add pipeline_mode=pl.Buffered(3)
    # to the x BlockSpec.
    xa = pl.pallas_call(
        functools.partial(_xa_kernel, scaling=scaling, tk=tk_eff,
                          single_k=(n_k == 1)),
        out_shape=jax.ShapeDtypeStruct((M, r_pad), jnp.float32),
        grid=(n_i, n_k),
        in_specs=[
            pl.BlockSpec((tm_eff, tk_eff), lambda i, k: (i, k)),   # x tile
            pl.BlockSpec((Kp, r_pad), lambda i, k: (0, 0)),        # A resident
        ],
        out_specs=pl.BlockSpec((tm_eff, r_pad), lambda i, k: (i, 0)),
        compiler_params=cparams1,
    )(x2d, ap)

    # --- Stage 2: Y = XA @ B  (N outermost -> each B slab DMA'd once total).
    out = pl.pallas_call(
        _xab_kernel,
        out_shape=jax.ShapeDtypeStruct((M, out_features), out_dtype),
        grid=(n_j, n_i),
        in_specs=[
            pl.BlockSpec((tm_eff, r_pad), lambda j, i: (i, 0)),    # XA tile
            pl.BlockSpec((r_pad, tn_eff), lambda j, i: (0, j)),    # B slab
        ],
        out_specs=pl.BlockSpec((tm_eff, tn_eff), lambda j, i: (i, j)),
        compiler_params=cparams2,
    )(xa, bp)

    return out


def init_params(key, in_features, r, out_features):
    """Mirrors the module's reset_parameters():
       lora_a ~ kaiming_uniform_(a=sqrt(5)) (torch fan_in of an (in, r) tensor
       is its second dim, i.e. r), lora_b = zeros."""
    a_slope = math.sqrt(5.0)
    fan_in = r
    gain = math.sqrt(2.0 / (1.0 + a_slope ** 2))
    bound = gain * math.sqrt(3.0 / fan_in)
    lora_a = jax.random.uniform(key, (in_features, r),
                                minval=-bound, maxval=bound, dtype=jnp.float32)
    lora_b = jnp.zeros((r, out_features), dtype=jnp.float32)
    return lora_a, lora_b


if __name__ == "__main__":
    in_features, out_features, r, lora_alpha = 32, 32, 4, 8
    scaling = lora_alpha / r

    key = jax.random.PRNGKey(0)
    k_x, k_a, k_b, k_c = jax.random.split(key, 4)

    # x: (batch=2, seq=8, hidden=32) -> flattened to (16, 32) in the wrapper.
    x = jax.random.normal(k_x, (2, 8, in_features), dtype=jnp.float32)
    lora_a, lora_b = init_params(k_a, in_features, r, out_features)

    # 1) Faithful module run (lora_b is zeros -> output is exactly zero).
    y = lora_forward(x, lora_a, lora_b, scaling)
    jax.block_until_ready(y)
    y_ref = scaling * (x.reshape(-1, in_features) @ lora_a @ lora_b)
    assert y.shape == y_ref.shape
    assert jnp.allclose(y, y_ref, atol=1e-6), "mismatch vs reference (zero-B)"

    # 2) Non-zero B: verifies the full matmul chain + scaling.
    #    (Moderate tolerance: TPU f32 matmuls may use reduced-precision MXU
    #    passes, in both the kernel and the jnp reference.)
    lora_b_nz = jax.random.normal(k_b, (r, out_features), dtype=jnp.float32)
    y2 = lora_forward(x, lora_a, lora_b_nz, scaling)
    y2_ref = scaling * (x.reshape(-1, in_features) @ lora_a @ lora_b_nz)
    assert jnp.allclose(y2, y2_ref, atol=3e-2, rtol=3e-2), "mismatch (non-zero B)"

    # 3) Ragged M (10 rows): exercises the partial edge block path (no padding).
    x3 = jax.random.normal(k_c, (10, in_features), dtype=jnp.float32)
    y3 = lora_forward(x3, lora_a, lora_b_nz, scaling)
    y3_ref = scaling * (x3 @ lora_a @ lora_b_nz)
    assert jnp.allclose(y3, y3_ref, atol=3e-2, rtol=3e-2), "mismatch (ragged M)"

    # 4) Multi-tile grids on every axis (small shapes, small forced tiles):
    #    M=40 (ragged vs tm=16), K=256 (2 K-blocks + resident-A slicing),
    #    N=384 (3 N-blocks).
    in2, out2 = 256, 384
    a2 = 0.1 * jax.random.normal(k_a, (in2, r), dtype=jnp.float32)
    b2 = jax.random.normal(k_b, (r, out2), dtype=jnp.float32)
    x4 = jax.random.normal(k_c, (5, 8, in2), dtype=jnp.float32)
    y4 = lora_forward(x4, a2, b2, scaling, tm=16, tk=128, tn=128)
    y4_ref = scaling * (x4.reshape(-1, in2) @ a2 @ b2)
    assert jnp.allclose(y4, y4_ref, atol=3e-2, rtol=3e-2), "mismatch (multi-tile)"

    # 5) bf16 feed (halves x HBM traffic; recommended for real workloads).
    y5 = lora_forward(x, lora_a, lora_b_nz, scaling, compute_dtype=jnp.bfloat16)
    assert jnp.allclose(y5.astype(jnp.float32), y2_ref, atol=0.5, rtol=0.1), \
        "mismatch (bf16 feed)"

    jax.block_until_ready((y, y2, y3, y4, y5))
    print("KERNEL_OK")
</pallas_src>

<mosaic_0001>
module attributes {stable_mosaic.version = 11 : i64} {
  func.func @_xa_kernel(%arg0: i32, %arg1: i32, %arg2: memref<16x32xf32, #tpu.memory_space<vmem>>, %arg3: memref<32x128xf32, #tpu.memory_space<vmem>>, %arg4: memref<16x128xf32, #tpu.memory_space<vmem>>) attributes {dimension_semantics = [#tpu.dimension_semantics<parallel>, #tpu.dimension_semantics<arbitrary>], iteration_bounds = array<i64: 1, 1>, scalar_prefetch = 0 : i64, scratch_operands = 0 : i64, tpu.core_type = #tpu.core_type<tc>, window_params = [{transform_indices = @transform_0, window_bounds = array<i64: 16, 32>}, {pipeline_mode = #tpu.pipeline_mode<synchronous>, transform_indices = @transform_1, window_bounds = array<i64: 32, 128>}, {transform_indices = @transform_2, window_bounds = array<i64: 16, 128>}]} {
    %c0_i32 = arith.constant 0 : i32
    %0 = arith.cmpi eq, %arg1, %c0_i32 : i32
    %1 = arith.extui %0 : i1 to i32
    %c0_i32_0 = arith.constant 0 : i32
    %2 = arith.cmpi ne, %1, %c0_i32_0 : i32
    scf.if %2 {
      %cst_10 = arith.constant 0.000000e+00 : f32
      %12 = vector.broadcast %cst_10 : f32 to vector<16x128xf32>
      %c0_11 = arith.constant 0 : index
      %c0_12 = arith.constant 0 : index
      %13 = vector.load %arg4[%c0_11, %c0_12] : memref<16x128xf32, #tpu.memory_space<vmem>>, vector<16x128xf32>
      tpu.vector_store %arg4[%c0_11, %c0_12], %12 {strides = array<i32>} : memref<16x128xf32, #tpu.memory_space<vmem>>, vector<16x128xf32>,
    } else {
    }
    %c0 = arith.constant 0 : index
    %c0_1 = arith.constant 0 : index
    %3 = vector.load %arg3[%c0, %c0_1] : memref<32x128xf32, #tpu.memory_space<vmem>>, vector<32x128xf32>
    %c0_2 = arith.constant 0 : index
    %c0_3 = arith.constant 0 : index
    %4 = vector.load %arg4[%c0_2, %c0_3] : memref<16x128xf32, #tpu.memory_space<vmem>>, vector<16x128xf32>
    %c0_4 = arith.constant 0 : index
    %c0_5 = arith.constant 0 : index
    %5 = vector.load %arg2[%c0_4, %c0_5] : memref<16x32xf32, #tpu.memory_space<vmem>>, vector<16x32xf32>
    %cst = arith.constant dense<0.000000e+00> : vector<16x128xf32>
    %6 = tpu.matmul %5, %3, %cst {dimension_numbers = #tpu.dot_dimension_numbers<[1], [0], [0], [1], [0, 0, 1, 1], [], []>} : vector<16x32xf32>, vector<32x128xf32>, vector<16x128xf32> -> vector<16x128xf32>
    %7 = arith.addf %4, %6 : vector<16x128xf32>
    %c0_6 = arith.constant 0 : index
    %c0_7 = arith.constant 0 : index
    %8 = vector.load %arg4[%c0_6, %c0_7] : memref<16x128xf32, #tpu.memory_space<vmem>>, vector<16x128xf32>
    tpu.vector_store %arg4[%c0_6, %c0_7], %7 {strides = array<i32>} : memref<16x128xf32, #tpu.memory_space<vmem>>, vector<16x128xf32>,
    %c0_i32_8 = arith.constant 0 : i32
    %9 = arith.cmpi eq, %arg1, %c0_i32_8 : i32
    %10 = arith.extui %9 : i1 to i32
    %c0_i32_9 = arith.constant 0 : i32
    %11 = arith.cmpi ne, %10, %c0_i32_9 : i32
    scf.if %11 {
      %c0_10 = arith.constant 0 : index
      %c0_11 = arith.constant 0 : index
      %12 = vector.load %arg4[%c0_10, %c0_11] : memref<16x128xf32, #tpu.memory_space<vmem>>, vector<16x128xf32>
      %cst_12 = arith.constant 2.000000e+00 : f32
      %13 = vector.broadcast %cst_12 : f32 to vector<16x128xf32>
      %14 = arith.mulf %12, %13 : vector<16x128xf32>
      %c0_13 = arith.constant 0 : index
      %c0_14 = arith.constant 0 : index
      %15 = vector.load %arg4[%c0_13, %c0_14] : memref<16x128xf32, #tpu.memory_space<vmem>>, vector<16x128xf32>
      tpu.vector_store %arg4[%c0_13, %c0_14], %14 {strides = array<i32>} : memref<16x128xf32, #tpu.memory_space<vmem>>, vector<16x128xf32>,
    } else {
    }
    return
  }
  func.func @transform_0(%arg0: i32, %arg1: i32) -> (i32, i32) {
    %c0_i32 = arith.constant 0 : i32
    return %arg0, %arg1 : i32, i32
  }
  func.func @transform_1(%arg0: i32, %arg1: i32) -> (i32, i32) {
    %c0_i32 = arith.constant 0 : i32
    %c0_i32_0 = arith.constant 0 : i32
    %c0_i32_1 = arith.constant 0 : i32
    return %c0_i32, %c0_i32_0 : i32, i32
  }
  func.func @transform_2(%arg0: i32, %arg1: i32) -> (i32, i32) {
    %c0_i32 = arith.constant 0 : i32
    %c0_i32_0 = arith.constant 0 : i32
    return %arg0, %c0_i32 : i32, i32
  }
}

</mosaic_0001>

<bundles_post_ra>
// kernel: tpu_custom_call.1
= control target key start
LH: loop header
LB: loop body
LE: loop exit
PB: predicated region body
PF: predicated region fallthrough
CT: control target
= control target key end

     0   :  { %7 = vsyncpa [#allocation3], 0  ;;  %s337_s0 = inlined_call_operand.hbm [shape: f32[16,32], index: 0, kind: input, shape index: {}]   ;;  %s338_s1 = inlined_call_operand.hbm [shape: f32[32,128], index: 1, kind: input, shape index: {}]   ;;  %s339_s2 = inlined_call_operand.hbm [shape: f32[16,128], index: 2, kind: output, shape index: {}]  }
   0x1   :  { %8 = vsyncpa [#allocation6], 0 }
   0x2   :  { %9 = vsyncpa [#allocation4], 0  ;;  %s272_s9 = smov [#allocation2]   ;;  %s200_s13 = scalar_lea.hbm %s337_s0, 256 }
   0x3   :  { %s15_s10 = sshll.u32 %s272_s9, 4  ;;  %p201_p0 = scmp.ne.s32.totalorder %s337_s0, %s200_s13  ;;  %s16_s10 = int_to_ptr.vmem [resolvable:$true] %s15_s10 }
   0x4   :  { %p204_p1 = scmp.lt.u32.totalorder %s200_s13, %s337_s0 }
   0x6   :  { %p206_p2 = pnand %p204_p1, %p201_p0 }
   0x8   :  { %209 = shalt.err (!%p206_p2)
}
   0x9   :  { %s210_s18 = scalar_lea.vmem %s16_s10, 256  ;;  %p215_p4 = scmp.lt.s32.totalorder %s16_s10, %s16_s10 }
   0xa   :  { %p211_p3 = scmp.ne.s32.totalorder %s16_s10, %s210_s18  ;;  %p216_p5 = scmp.lt.s32.totalorder %s210_s18, %s210_s18 }
   0xc   :  { %p217_p6 = por %p216_p5, %p215_p4 }
   0xe   :  { %p218_p7 = pnand %p217_p6, %p211_p3 }
  0x10   :  { %221 = shalt.err (!%p218_p7)
}
  0x11   :  { %s273_s19 = smov 128   ;;  %s274_s20 = smov 8  }
  0x12   :  { %21 = dma.hbm_to_vmem [thread:$0]  %s337_s0, 256, %s16_s10, [#allocation3], %s273_s19, %s273_s19, %s274_s20  }
  0x13   :  { %s275_s23 = smov [#allocation5]   ;;  %s222_s27 = scalar_lea.hbm %s338_s1, 512 }
  0x14   :  { %s27_s24 = sshll.u32 %s275_s23, 4  ;;  %p223_p8 = scmp.ne.s32.totalorder %s338_s1, %s222_s27  ;;  %s28_s24 = int_to_ptr.vmem [resolvable:$true] %s27_s24 }
  0x15   :  { %p226_p9 = scmp.lt.u32.totalorder %s222_s27, %s338_s1 }
  0x17   :  { %p228_p10 = pnand %p226_p9, %p223_p8 }
  0x19   :  { %231 = shalt.err (!%p228_p10)
}
  0x1a   :  { %s232_s4 = scalar_lea.vmem %s28_s24, 512  ;;  %p237_p12 = scmp.lt.s32.totalorder %s28_s24, %s28_s24 }
  0x1b   :  { %p233_p11 = scmp.ne.s32.totalorder %s28_s24, %s232_s4  ;;  %p238_p13 = scmp.lt.s32.totalorder %s232_s4, %s232_s4 }
  0x1d   :  { %p239_p0 = por %p238_p13, %p237_p12 }
  0x1f   :  { %p240_p1 = pnand %p239_p0, %p233_p11 }
  0x21   :  { %243 = shalt.err (!%p240_p1)
}
  0x22   :  { %33 = dma.hbm_to_vmem [thread:$0]  %s338_s1, 512, %s28_s24, [#allocation6], %s273_s19, %s273_s19, %s274_s20  }
  0x23   :  { %266 = dma.done.wait [#allocation3], 256  }
  0x24   :  { %267 = vsyncadd [#allocation3], 4294967040 }
  0x25   :  { %268 = dma.done.wait [#allocation6], 512  }
  0x26   :  { %269 = vsyncadd [#allocation6], 4294966784  ;;  %vm54_vm0 = vcmask 261120   ;;  %v46_v0 = vld [vmem:[#allocation5] sm:$0xff]  ;;  %v47_v1 = vld [vmem:[#allocation5 + $0x8] sm:$0xff]  ;;  %s276_s1 = smov [#allocation7]  }
  0x27   :  { %v48_v2 = vld [vmem:[#allocation5 + $0x10] sm:$0xff]  ;;  %v186_v3 = vpack.c.bf16 %v47_v1, %v46_v0  ;;  %v49_v4 = vld [vmem:[#allocation5 + $0x18] sm:$0xff]  ;;  %s154_s6 = sshll.u32 %s276_s1, 4  ;;  %s155_s6 = int_to_ptr.vmem [resolvable:$true] %s154_s6 }
  0x28   :  { %v52_v5 = vld [vmem:[#allocation2] sm:$0xff]  ;;  %v190_v6 = vpack.c.bf16 %v49_v4, %v48_v2  ;;  %v53_v7 = vld [vmem:[#allocation2 + $0x8] sm:$0xff]  ;;  %s244_s7 = scalar_lea.vmem %s155_s6, 256  ;;  %p249_p3 = scmp.lt.s32.totalorder %s155_s6, %s155_s6 }
  0x29   :  { %183 = vmatprep.mubr.msk.f32.mxu0 %vm54_vm0, %v52_v5  ;;  %187 = vmatprep.subr.bf16.mxu0 %v186_v3  ;;  %p245_p2 = scmp.ne.s32.totalorder %s155_s6, %s244_s7  ;;  %p250_p4 = scmp.lt.s32.totalorder %s244_s7, %s244_s7 }
  0x2a   :  { %189 = vmatpush3.bf16.msra.mxu0 %v186_v3 }
  0x2b   :  { %191 = vmatprep.subr.bf16.mxu0 %v190_v6  ;;  %p251_p5 = por %p250_p4, %p249_p3 }
  0x2d   :  { %p252_p6 = pnand %p251_p5, %p245_p2 }
  0x2e   :  { %193 = vmatpush3.bf16.msra.mxu0 %v190_v6 }
  0x31   :  { %184 = vmatmul.mubr.msk.f32.vlgmr.msra.gmra.mrb[0].mxu0 %vm54_vm0, %v53_v7 }
 0x104   :  { %v185_v8 = vpop.f32.mrb[0].mxu0 }
 0x105   :  { %v127_v9 = vpop.f32.mrb[1].mxu0  ;;  %v146_v10 = vmul.f32 2.0, %v185_v8 }
 0x106   :  { %v145_v11 = vmul.f32 2.0, %v127_v9 }
 0x107   :  { %148 = vst [vmem:[#allocation7 + $0x8] sm:$0xff] %v146_v10 }
 0x108   :  { %147 = vst [vmem:[#allocation7] sm:$0xff] %v145_v11 }
 0x109   :  { %255 = shalt.err (!%p252_p6)
}
 0x10a   :  { %s256_s10 = scalar_lea.hbm %s339_s2, 256 }
 0x10b   :  { %p257_p7 = scmp.ne.s32.totalorder %s339_s2, %s256_s10  ;;  %p260_p8 = scmp.lt.u32.totalorder %s256_s10, %s339_s2 }
 0x10d   :  { %p262_p9 = pnand %p260_p8, %p257_p7 }
 0x10f   :  { %265 = shalt.err (!%p262_p9)
}
 0x110   :  { %160 = dma.vmem_to_hbm [thread:$0]  %s155_s6, 256, %s339_s2, [#allocation4], %s273_s19, %s273_s19, %s274_s20  }
 0x111   :  { %270 = dma.done.wait [#allocation4], 256  }
 0x112   :  { %271 = vsyncadd [#allocation4], 4294967040 }
 0x113   :  { %164 = vsyncpa [#allocation3], 1 }
 0x114   :  { %165 = vsyncpa [#allocation6], 1 }
 0x115   :  { %166 = vsyncpa [#allocation4], 1 }

</bundles_post_ra>
